<compile_context>
chip_gen: v7x
topology: tpu7x:2x2x1
jax: 0.10.0
libtpu: 0.0.40
codegen_flags: <defaults>
</compile_context>

<pallas_src>
import functools

import jax
import jax.numpy as jnp
from jax.experimental import pallas as pl
from jax.experimental.pallas import tpu as pltpu


def _attention_kernel(g_ref, x_ref, wg_t_ref, wx_t_ref, b_sum_ref,
                      wpsi_ref, bpsi_ref, out_ref):
    # g_ref: (F_g, TM), x_ref: (F_l, TM)        -- pixels on lanes
    # wg_t_ref: (F_int, F_g), wx_t_ref: (F_int, F_l)
    # b_sum_ref: (F_int, 1)  (= bg + bx, BN-folded)
    # wpsi_ref: (F_int, 1), bpsi_ref: (1, 1)
    x_tile = x_ref[...]

    g1 = jnp.dot(wg_t_ref[...], g_ref[...],
                 preferred_element_type=jnp.float32)              # (F_int, TM)
    x1 = jnp.dot(wx_t_ref[...], x_tile,
                 preferred_element_type=jnp.float32)              # (F_int, TM)
    p = jnp.maximum(g1 + x1 + b_sum_ref[...], 0.0)                # ReLU

    # psi projection: broadcast multiply + sublane reduce on the VPU/XLU
    # (MXU left free; avoids a wasteful (TM, F_int) @ (F_int, 1) matmul).
    logit = jnp.sum(p * wpsi_ref[...], axis=0, keepdims=True) + bpsi_ref[...]
    psi = jax.nn.sigmoid(logit)                                   # (1, TM)

    out_ref[...] = (x_tile * psi).astype(out_ref.dtype)


def _fold_bn(w, b, gamma, beta, mean, var, eps=1e-5):
    """Fold eval-mode BatchNorm into a (Cin, Cout) weight and (Cout,) bias."""
    s = gamma / jnp.sqrt(var + eps)
    w_eff = w * s[None, :]
    b_eff = (b - mean) * s + beta
    return w_eff, b_eff


def _pick_tile(hw, tm_max):
    """Largest pixel tile <= tm_max that divides H*W and is lane-friendly."""
    if hw <= tm_max:
        return hw
    t = (tm_max // 128) * 128
    while t >= 128:
        if hw % t == 0:
            return t
        t -= 128
    return hw  # fallback: whole pixel row per image


@functools.partial(jax.jit, static_argnames=("tm",))
def attention_block(g, x, params, tm=1024):
    """g: (N, F_g, H, W), x: (N, F_l, H, W) in NCHW. Returns (N, F_l, H, W)."""
    N, F_g, H, W = g.shape
    F_l = x.shape[1]
    HW = H * W

    wg, bg = _fold_bn(params["wg"], params["bg"], params["gamma_g"],
                      params["beta_g"], params["mean_g"], params["var_g"])
    wx, bx = _fold_bn(params["wx"], params["bx"], params["gamma_x"],
                      params["beta_x"], params["mean_x"], params["var_x"])
    wpsi, bpsi = _fold_bn(params["wpsi"], params["bpsi"], params["gamma_p"],
                          params["beta_p"], params["mean_p"], params["var_p"])
    F_int = wg.shape[1]

    # Transposed weights for the channels-on-sublanes layout; pre-summed bias.
    wg_t = wg.T                                  # (F_int, F_g)
    wx_t = wx.T                                  # (F_int, F_l)
    b_sum = (bg + bx).reshape(F_int, 1)          # (F_int, 1)
    wpsi2 = wpsi.reshape(F_int, 1)               # (F_int, 1)
    bpsi2 = bpsi.reshape(1, 1)                   # (1, 1)

    # NCHW -> (N, C, H*W): contiguous reshape, no transpose / extra HBM pass.
    g3 = g.reshape(N, F_g, HW)
    x3 = x.reshape(N, F_l, HW)

    tile = _pick_tile(HW, tm)
    assert HW % tile == 0, "H*W must be divisible by the chosen pixel tile"
    grid = (N, HW // tile)

    # VMEM budget: double-buffered g/x/out tiles + weights, with headroom,
    # capped well below v7x's 64 MiB physical (also covers v5e's 16 MiB default).
    dt_bytes = jnp.dtype(x.dtype).itemsize
    tile_bytes = tile * (F_g + 2 * F_l) * dt_bytes
    weight_bytes = 4 * (F_int * (F_g + F_l) + 2 * F_int + 1)
    vmem_limit = int(min(max(4 * tile_bytes + 2 * weight_bytes + (2 << 20),
                             16 << 20), 48 << 20))

    M = N * HW
    cost = pl.CostEstimate(
        flops=2 * M * F_int * (F_g + F_l + 1),
        transcendentals=M,                                  # one sigmoid / pixel
        bytes_accessed=dt_bytes * M * (F_g + 2 * F_l) + weight_bytes,
    )

    out3 = pl.pallas_call(
        _attention_kernel,
        out_shape=jax.ShapeDtypeStruct((N, F_l, HW), x.dtype),
        grid_spec=pltpu.PrefetchScalarGridSpec(
            num_scalar_prefetch=0,
            grid=grid,
            in_specs=[
                pl.BlockSpec((None, F_g, tile), lambda n, j: (n, 0, j)),   # g
                pl.BlockSpec((None, F_l, tile), lambda n, j: (n, 0, j)),   # x
                pl.BlockSpec((F_int, F_g), lambda n, j: (0, 0)),           # Wg^T
                pl.BlockSpec((F_int, F_l), lambda n, j: (0, 0)),           # Wx^T
                pl.BlockSpec((F_int, 1), lambda n, j: (0, 0)),             # bg+bx
                pl.BlockSpec((F_int, 1), lambda n, j: (0, 0)),             # Wpsi
                pl.BlockSpec((1, 1), lambda n, j: (0, 0)),                 # bpsi
            ],
            out_specs=pl.BlockSpec((None, F_l, tile), lambda n, j: (n, 0, j)),
        ),
        compiler_params=pltpu.CompilerParams(
            dimension_semantics=("parallel", "parallel"),
            vmem_limit_bytes=vmem_limit),
        cost_estimate=cost,
    )(g3, x3, wg_t, wx_t, b_sum, wpsi2, bpsi2)

    return out3.reshape(N, F_l, H, W)


def _reference(g, x, params):
    """Pure-JAX reference of the PyTorch forward (eval-mode BN)."""
    wg, bg = _fold_bn(params["wg"], params["bg"], params["gamma_g"],
                      params["beta_g"], params["mean_g"], params["var_g"])
    wx, bx = _fold_bn(params["wx"], params["bx"], params["gamma_x"],
                      params["beta_x"], params["mean_x"], params["var_x"])
    wpsi, bpsi = _fold_bn(params["wpsi"], params["bpsi"], params["gamma_p"],
                          params["beta_p"], params["mean_p"], params["var_p"])
    g_n = jnp.transpose(g, (0, 2, 3, 1))
    x_n = jnp.transpose(x, (0, 2, 3, 1))
    g1 = g_n @ wg + bg
    x1 = x_n @ wx + bx
    p = jnp.maximum(g1 + x1, 0.0)
    psi = jax.nn.sigmoid(p @ wpsi.reshape(-1, 1) + bpsi)
    out = x_n * psi
    return jnp.transpose(out, (0, 3, 1, 2))


def _init_params(key, F_g, F_l, F_int):
    ks = jax.random.split(key, 9)
    p = {
        # 1x1 conv kernels stored as (Cin, Cout)
        "wg": jax.random.normal(ks[0], (F_g, F_int), jnp.float32) * 0.2,
        "bg": jax.random.normal(ks[1], (F_int,), jnp.float32) * 0.1,
        "wx": jax.random.normal(ks[2], (F_l, F_int), jnp.float32) * 0.2,
        "bx": jax.random.normal(ks[3], (F_int,), jnp.float32) * 0.1,
        "wpsi": jax.random.normal(ks[4], (F_int, 1), jnp.float32) * 0.2,
        "bpsi": jax.random.normal(ks[5], (1,), jnp.float32) * 0.1,
        # BatchNorm (eval-mode) parameters / running stats
        "gamma_g": 1.0 + 0.1 * jax.random.normal(ks[6], (F_int,), jnp.float32),
        "beta_g": jnp.linspace(-0.1, 0.1, F_int, dtype=jnp.float32),
        "mean_g": 0.05 * jnp.arange(F_int, dtype=jnp.float32),
        "var_g": jnp.ones((F_int,), jnp.float32) * 0.9,
        "gamma_x": 1.0 + 0.1 * jax.random.normal(ks[7], (F_int,), jnp.float32),
        "beta_x": jnp.linspace(0.1, -0.1, F_int, dtype=jnp.float32),
        "mean_x": -0.03 * jnp.arange(F_int, dtype=jnp.float32),
        "var_x": jnp.ones((F_int,), jnp.float32) * 1.1,
        "gamma_p": jnp.array([1.05], jnp.float32),
        "beta_p": jnp.array([0.02], jnp.float32),
        "mean_p": jnp.array([0.01], jnp.float32),
        "var_p": jnp.array([0.95], jnp.float32),
    }
    return p
    # TODO(synk): training-mode BatchNorm (batch statistics) is not modeled;
    # eval-mode (running-stats) BN is folded into the 1x1 convs.


if __name__ == "__main__":
    N, F_g, F_l, F_int, Hs, Ws = 2, 4, 4, 8, 16, 16
    key = jax.random.PRNGKey(0)
    kg, kx, kp = jax.random.split(key, 3)
    g = jax.random.normal(kg, (N, F_g, Hs, Ws), jnp.float32)
    x = jax.random.normal(kx, (N, F_l, Hs, Ws), jnp.float32)
    params = _init_params(kp, F_g, F_l, F_int)

    out = attention_block(g, x, params)
    out = jax.block_until_ready(out)

    ref = _reference(g, x, params)
    assert out.shape == (N, F_l, Hs, Ws)
    assert jnp.allclose(out, ref, atol=1e-5, rtol=1e-5), "mismatch vs reference"
    print("KERNEL_OK")
</pallas_src>

<mosaic_0001>
module attributes {stable_mosaic.version = 11 : i64} {
  func.func @_attention_kernel(%arg0: i32, %arg1: i32, %arg2: memref<1x4x256xf32, #tpu.memory_space<vmem>>, %arg3: memref<1x4x256xf32, #tpu.memory_space<vmem>>, %arg4: memref<8x4xf32, #tpu.memory_space<vmem>>, %arg5: memref<8x4xf32, #tpu.memory_space<vmem>>, %arg6: memref<8x1xf32, #tpu.memory_space<vmem>>, %arg7: memref<8x1xf32, #tpu.memory_space<vmem>>, %arg8: memref<1x1xf32, #tpu.memory_space<vmem>>, %arg9: memref<1x4x256xf32, #tpu.memory_space<vmem>>) attributes {dimension_semantics = [#tpu.dimension_semantics<parallel>, #tpu.dimension_semantics<parallel>], iteration_bounds = array<i64: 2, 1>, scalar_prefetch = 0 : i64, scratch_operands = 0 : i64, tpu.core_type = #tpu.core_type<tc>, window_params = [{transform_indices = @transform_0, window_bounds = array<i64: 1, 4, 256>}, {transform_indices = @transform_1, window_bounds = array<i64: 1, 4, 256>}, {pipeline_mode = #tpu.pipeline_mode<synchronous>, transform_indices = @transform_2, window_bounds = array<i64: 8, 4>}, {pipeline_mode = #tpu.pipeline_mode<synchronous>, transform_indices = @transform_3, window_bounds = array<i64: 8, 4>}, {pipeline_mode = #tpu.pipeline_mode<synchronous>, transform_indices = @transform_4, window_bounds = array<i64: 8, 1>}, {pipeline_mode = #tpu.pipeline_mode<synchronous>, transform_indices = @transform_5, window_bounds = array<i64: 8, 1>}, {pipeline_mode = #tpu.pipeline_mode<synchronous>, transform_indices = @transform_6, window_bounds = array<i64: 1, 1>}, {transform_indices = @transform_7, window_bounds = array<i64: 1, 4, 256>}]} {
    %c0 = arith.constant 0 : index
    %c0_0 = arith.constant 0 : index
    %c0_1 = arith.constant 0 : index
    %0 = vector.load %arg3[%c0, %c0_0, %c0_1] : memref<1x4x256xf32, #tpu.memory_space<vmem>>, vector<1x4x256xf32>
    %1 = vector.shape_cast %0 : vector<1x4x256xf32> to vector<4x256xf32>
    %c0_2 = arith.constant 0 : index
    %c0_3 = arith.constant 0 : index
    %2 = vector.load %arg4[%c0_2, %c0_3] : memref<8x4xf32, #tpu.memory_space<vmem>>, vector<8x4xf32>
    %c0_4 = arith.constant 0 : index
    %c0_5 = arith.constant 0 : index
    %c0_6 = arith.constant 0 : index
    %3 = vector.load %arg2[%c0_4, %c0_5, %c0_6] : memref<1x4x256xf32, #tpu.memory_space<vmem>>, vector<1x4x256xf32>
    %4 = vector.shape_cast %3 : vector<1x4x256xf32> to vector<4x256xf32>
    %cst = arith.constant dense<0.000000e+00> : vector<8x256xf32>
    %5 = tpu.matmul %2, %4, %cst {dimension_numbers = #tpu.dot_dimension_numbers<[1], [0], [0], [1], [0, 0, 1, 1], [], []>} : vector<8x4xf32>, vector<4x256xf32>, vector<8x256xf32> -> vector<8x256xf32>
    %c0_7 = arith.constant 0 : index
    %c0_8 = arith.constant 0 : index
    %6 = vector.load %arg5[%c0_7, %c0_8] : memref<8x4xf32, #tpu.memory_space<vmem>>, vector<8x4xf32>
    %cst_9 = arith.constant dense<0.000000e+00> : vector<8x256xf32>
    %7 = tpu.matmul %6, %1, %cst_9 {dimension_numbers = #tpu.dot_dimension_numbers<[1], [0], [0], [1], [0, 0, 1, 1], [], []>} : vector<8x4xf32>, vector<4x256xf32>, vector<8x256xf32> -> vector<8x256xf32>
    %8 = arith.addf %5, %7 : vector<8x256xf32>
    %c0_10 = arith.constant 0 : index
    %c0_11 = arith.constant 0 : index
    %9 = vector.load %arg6[%c0_10, %c0_11] : memref<8x1xf32, #tpu.memory_space<vmem>>, vector<8x1xf32>
    %10 = vector.broadcast %9 : vector<8x1xf32> to vector<8x256xf32>
    %11 = arith.addf %8, %10 : vector<8x256xf32>
    %cst_12 = arith.constant 0.000000e+00 : f32
    %12 = vector.broadcast %cst_12 : f32 to vector<8x256xf32>
    %13 = arith.maximumf %11, %12 : vector<8x256xf32>
    %c0_13 = arith.constant 0 : index
    %c0_14 = arith.constant 0 : index
    %14 = vector.load %arg7[%c0_13, %c0_14] : memref<8x1xf32, #tpu.memory_space<vmem>>, vector<8x1xf32>
    %15 = vector.broadcast %14 : vector<8x1xf32> to vector<8x256xf32>
    %16 = arith.mulf %13, %15 : vector<8x256xf32>
    %cst_15 = arith.constant dense<0.000000e+00> : vector<256xf32>
    %17 = vector.multi_reduction <add>, %16, %cst_15 [0] : vector<8x256xf32> to vector<256xf32>
    %18 = vector.shape_cast %17 : vector<256xf32> to vector<1x256xf32>
    %c0_16 = arith.constant 0 : index
    %c0_17 = arith.constant 0 : index
    %19 = vector.load %arg8[%c0_16, %c0_17] : memref<1x1xf32, #tpu.memory_space<vmem>>, vector<1x1xf32>
    %20 = vector.broadcast %19 : vector<1x1xf32> to vector<1x256xf32>
    %21 = arith.addf %18, %20 : vector<1x256xf32>
    %22 = arith.negf %21 : vector<1x256xf32>
    %23 = math.exp %22 : vector<1x256xf32>
    %cst_18 = arith.constant 1.000000e+00 : f32
    %24 = vector.broadcast %cst_18 : f32 to vector<1x256xf32>
    %25 = arith.addf %24, %23 : vector<1x256xf32>
    %26 = arith.divf %24, %25 : vector<1x256xf32>
    %27 = vector.broadcast %26 : vector<1x256xf32> to vector<4x256xf32>
    %28 = arith.mulf %1, %27 : vector<4x256xf32>
    %c0_19 = arith.constant 0 : index
    %c0_20 = arith.constant 0 : index
    %c0_21 = arith.constant 0 : index
    %29 = vector.load %arg9[%c0_19, %c0_20, %c0_21] : memref<1x4x256xf32, #tpu.memory_space<vmem>>, vector<1x4x256xf32>
    %30 = vector.shape_cast %29 : vector<1x4x256xf32> to vector<4x256xf32>
    %31 = vector.shape_cast %28 : vector<4x256xf32> to vector<1x4x256xf32>
    tpu.vector_store %arg9[%c0_19, %c0_20, %c0_21], %31 {strides = array<i32>} : memref<1x4x256xf32, #tpu.memory_space<vmem>>, vector<1x4x256xf32>,
    return
  }
  func.func @transform_0(%arg0: i32, %arg1: i32) -> (i32, i32, i32) {
    %c0_i32 = arith.constant 0 : i32
    %c0_i32_0 = arith.constant 0 : i32
    return %arg0, %c0_i32, %arg1 : i32, i32, i32
  }
  func.func @transform_1(%arg0: i32, %arg1: i32) -> (i32, i32, i32) {
    %c0_i32 = arith.constant 0 : i32
    %c0_i32_0 = arith.constant 0 : i32
    return %arg0, %c0_i32, %arg1 : i32, i32, i32
  }
  func.func @transform_2(%arg0: i32, %arg1: i32) -> (i32, i32) {
    %c0_i32 = arith.constant 0 : i32
    %c0_i32_0 = arith.constant 0 : i32
    %c0_i32_1 = arith.constant 0 : i32
    return %c0_i32, %c0_i32_0 : i32, i32
  }
  func.func @transform_3(%arg0: i32, %arg1: i32) -> (i32, i32) {
    %c0_i32 = arith.constant 0 : i32
    %c0_i32_0 = arith.constant 0 : i32
    %c0_i32_1 = arith.constant 0 : i32
    return %c0_i32, %c0_i32_0 : i32, i32
  }
  func.func @transform_4(%arg0: i32, %arg1: i32) -> (i32, i32) {
    %c0_i32 = arith.constant 0 : i32
    %c0_i32_0 = arith.constant 0 : i32
    %c0_i32_1 = arith.constant 0 : i32
    return %c0_i32, %c0_i32_0 : i32, i32
  }
  func.func @transform_5(%arg0: i32, %arg1: i32) -> (i32, i32) {
    %c0_i32 = arith.constant 0 : i32
    %c0_i32_0 = arith.constant 0 : i32
    %c0_i32_1 = arith.constant 0 : i32
    return %c0_i32, %c0_i32_0 : i32, i32
  }
  func.func @transform_6(%arg0: i32, %arg1: i32) -> (i32, i32) {
    %c0_i32 = arith.constant 0 : i32
    %c0_i32_0 = arith.constant 0 : i32
    %c0_i32_1 = arith.constant 0 : i32
    return %c0_i32, %c0_i32_0 : i32, i32
  }
  func.func @transform_7(%arg0: i32, %arg1: i32) -> (i32, i32, i32) {
    %c0_i32 = arith.constant 0 : i32
    %c0_i32_0 = arith.constant 0 : i32
    return %arg0, %c0_i32, %arg1 : i32, i32, i32
  }
}

</mosaic_0001>

<bundles_post_ra>
// kernel: attention_block.1
= control target key start
LH: loop header
LB: loop body
LE: loop exit
PB: predicated region body
PF: predicated region fallthrough
CT: control target
= control target key end

     0   :  { %s820_s26 = smov 0   ;;  %s822_s27 = smov 0   ;;  %s879_s0 = inlined_call_operand.vmem [shape: f32[2,4,256], index: 0, kind: input, shape index: {}]   ;;  %s880_s1 = inlined_call_operand.vmem [shape: f32[2,4,256], index: 1, kind: input, shape index: {}]   ;;  %s881_s2 = inlined_call_operand.vmem [shape: f32[8,4], index: 2, kind: input, shape index: {}]   ;;  %s882_s3 = inlined_call_operand.vmem [shape: f32[8,4], index: 3, kind: input, shape index: {}]   ;;  %s883_s4 = inlined_call_operand.vmem [shape: f32[8,1], index: 4, kind: input, shape index: {}]   ;;  %s884_s5 = inlined_call_operand.vmem [shape: f32[8,1], index: 5, kind: input, shape index: {}]   ;;  %s885_s6 = inlined_call_operand.<no memory space> [shape: f32[1,1], index: 6, kind: input, shape index: {}]   ;;  %s886_s7 = inlined_call_operand.vmem [shape: f32[2,4,256], index: 7, kind: output, shape index: {}]  }
   0x1   :  { %v12_v0 = vstv %s885_s6  ;;  %s824_s28 = smov 0  }
   0x2   :  { %13 = vst [vmem:[#allocation2] sm:$0x1] %v12_v0 }
   0x3 LB: > { %s31_s6 = sadd.s32 1, %s769_s27  ;;  %p691_p0 = scmp.ge.s32.totalorder %s773_s28, 1  ;;  %s773_s28 = sphi %s824_s28, %s19_s28   ;;  %s769_s27 = sphi %s822_s27, %s888_s27   ;;  %s765_s26 = sphi %s820_s26, %s887_s26  }
   0x4   : > { %p33_p1 = scmp.ge.s32.totalorder %s31_s6, 2  ;;  %p277_p2 = scmp.lt.s32.totalorder %s773_s28, 3 }
   0x6   : > { %s890_s6 = smov (%p33_p1, %s31_s6), 0  ;;  %p278_p3 = pnand %p691_p0, %p277_p2 }
   0x7   : > { %p327_p4 = scmp.lt.s32.totalorder (!%p278_p3), %s765_s26, 1  ;;  %v775_v1 = vmov (!%p278_p3), 0.0   ;;  %v522_v2 = vld [vmem:[%s883_s4] sm:$0xff] (!%p278_p3)  ;;  %v776_v4 = vmov (!%p278_p3), 0   ;;  %vm366_vm0 = vcmask (!%p278_p3), 1043456   ;;  %vm362_vm1 = vcmask (!%p278_p3), 31744  }
   0x8   : > { %281 = sbr.rel (%p278_p3) target bundleno = 290 (0x122), region = 48  ;;  %435 = vmatprep.mubr.f32.mxu1 (!%p278_p3), %v775_v1  ;;  %515 = vmatprep.mubr.f32.mxu0 (!%p278_p3), %v775_v1  ;;  %v532_v5 = vld [vmem:[%s884_s5] sm:$0xff] (!%p278_p3)  ;;  %v558_v22 = vlaneseq (!%p278_p3) }
   0x9   : > { %v552_v3 = vld [vmem:[#allocation2] sm:$0x1] (!%p278_p3)  ;;  %739 = vset.pattern.permute.xlu0 (!%p278_p3), %v776_v4  ;;  %740 = vset.pattern.permute.xlu1 (!%p278_p3), %v776_v4 }
   0xa   : > { %525 = vperm.xlu0 (!%p278_p3), %739, %v522_v2   ;;  %555 = vperm.xlu1 (!%p278_p3), %740, %v552_v3   ;;  %v359_v10 = vld [vmem:[%s882_s3] sm:$0xff] (!%p278_p3)  ;;  %v559_v28 = vshrl.u32 (!%p278_p3), %v558_v22, 7 }
   0xb   : > { %v357_v11 = vld [vmem:[%s881_s2] sm:$0xff] (!%p278_p3) }
   0xc   : > { %v560_v33 = vsub.s32 (!%p278_p3), 0, %v559_v28 }
   0xe   : > { %535 = vperm.xlu0 (!%p278_p3), %739, %v532_v5  }
   0xf   : > { %s892_s26 = smov (!%p327_p4, %s765_s26), 1 }
  0x10   : > { %s841_s8 = sshll.u32 %s892_s26, 3 }
  0x11   : > { %s344_s13 = scalar_lea.vmem %s880_s1, %s841_s8  ;;  %s334_s16 = scalar_lea.vmem %s879_s0, %s841_s8 }
  0x12   : > { %v850_v6 = vld [vmem:[%s344_s13] sm:$0xff]  ;;  %s354_s23 = scalar_lea.vmem %s886_s7, %s841_s8 }
  0x13   : > { %v361_v7 = vcombine.high %v850_v6, %v850_v6  ;;  %v358_v8 = vld [vmem:[%s334_s16] sm:$0xff] }
  0x14   : > { %v443_v9 = vcombine.high %v358_v8, %v358_v8 }
  0x15   : > { %698 = vmatprep.subr.msk.mxu1 %vm366_vm0, %v361_v7 }
  0x16   : > { %701 = vmatprep.subr.msk.mxu0 %vm366_vm0, %v443_v9  ;;  %699 = vmatpush1.msk.msra.mxu1 %vm366_vm0, %v850_v6 }
  0x17   : > { %702 = vmatpush1.msk.msra.mxu0 %vm366_vm0, %v358_v8  ;;  %700 = vmatmul.mubr.msk.f32.vlgmr.msra.gmra.mrb[0].mxu1 %vm362_vm1, %v359_v10 }
  0x18   : > { %703 = vmatmul.mubr.msk.f32.vlgmr.msra.gmra.mrb[0].mxu0 %vm362_vm1, %v357_v11 }
  0x89   : > { %v526_v12 = vpop.permute.xlu0 %525  ;;  %v556_v35 = vpop.permute.xlu1 %555 }
  0x8a   : > { %v561_v39 = vrot.slane %v556_v35, %v560_v33 }
  0x8d   : > { %v536_v23 = vpop.permute.xlu0 %535 }
  0xea   : > { %v437_v13 = vpop.f32.mrb[0].mxu1 }
  0xeb   : > { %v517_v14 = vpop.f32.mrb[0].mxu0  ;;  %v439_v15 = vpop.f32.mrb[1].mxu1 }
  0xec   : > { %v518_v16 = vadd.f32 %v517_v14, %v437_v13  ;;  %v519_v17 = vpop.f32.mrb[1].mxu0 }
  0xed   : > { %v520_v18 = vadd.f32 %v519_v17, %v439_v15 }
  0xee   : > { %v528_v19 = vadd.f32 %v526_v12, %v518_v16 }
  0xef   : > { %v529_v20 = vadd.f32 %v526_v12, %v520_v18 }
  0xf0   : > { %v530_v21 = vmax.f32 %v528_v19, 0.0 }
  0xf1   : > { %v531_v24 = vmax.f32 %v529_v20, 0.0 }
  0xf2   : > { %v538_v25 = vmul.f32 %v536_v23, %v530_v21 }
  0xf3   : > { %v539_v26 = vmul.f32 %v536_v23, %v531_v24 }
  0xf4   : > { %v540_v27 = vrot.slane %v538_v25, 4 }
  0xf5   : > { %v546_v29 = vrot.slane %v539_v26, 4 }
  0xf6   : > { %v541_v30 = vadd.f32 %v540_v27, %v538_v25 }
  0xf7   : > { %v547_v31 = vadd.f32 %v546_v29, %v539_v26 }
  0xf8   : > { %v542_v32 = vrot.slane %v541_v30, 2 }
  0xf9   : > { %v548_v34 = vrot.slane %v547_v31, 2 }
  0xfa   : > { %v543_v36 = vadd.f32 %v542_v32, %v541_v30 }
  0xfb   : > { %v549_v37 = vadd.f32 %v548_v34, %v547_v31 }
  0xfc   : > { %v544_v38 = vrot.slane %v543_v36, 1 }
  0xfd   : > { %v550_v40 = vrot.slane %v549_v37, 1 }
  0xfe   : > { %v545_v41 = vadd.f32 %v544_v38, %v543_v36 }
  0xff   : > { %v551_v42 = vadd.f32 %v550_v40, %v549_v37 }
 0x100   : > { %v562_v43 = vadd.f32 %v561_v39, %v545_v41 }
 0x101   : > { %v563_v44 = vadd.f32 %v561_v39, %v551_v42 }
 0x102   : > { %v704_v45 = vmul.f32 -1.442695, %v562_v43 }
 0x103   : > { %v705_v46 = vmul.f32 -1.442695, %v563_v44 }
 0x104   : > { %743 = vpow2.f32 %v704_v45 }
 0x105   : > { %745 = vpow2.f32 %v705_v46 }
 0x10e   : > { %v744_v47 = vpop.eup %743 }
 0x10f   : > { %v746_v48 = vpop.eup %745  ;;  %v570_v49 = vadd.f32 1.0, %v744_v47 }
 0x110   : > { %v571_v50 = vadd.f32 1.0, %v746_v48 }
 0x111   : > { %747 = vrcp.f32 %v570_v49 }
 0x112   : > { %749 = vrcp.f32 %v571_v50 }
 0x11b   : > { %v748_v51 = vpop.eup %747 }
 0x11c   : > { %v750_v52 = vpop.eup %749 }
 0x11d   : > { %v578_v53 = vcombine.low %v748_v51, %v750_v52 }
 0x11f   : > { %v580_v54 = vmul.f32 %v578_v53, %v850_v6 }
 0x121   : > { %581 = vst [vmem:[%s354_s23] sm:$0xff] %v580_v54 }
 0x122 PF: > { %s19_s28 = sadd.s32 1, %s773_s28   ;;  %s887_s26 = smov %s769_s27 }
 0x123   : > { %p16_p5 = scmp.ge.s32.totalorder %s19_s28, 4   ;;  %s888_s27 = smov %s890_s6 }
 0x125   :  { %18 = sbr.rel (!%p16_p5) target bundleno = 3 (0x3), region = 81 }

</bundles_post_ra>
